<compile_context>
chip_gen: v7x
topology: tpu7x:2x2x1
jax: 0.10.0
libtpu: 0.0.40
codegen_flags: <defaults>
</compile_context>

<pallas_src>
import functools
import math

import jax
import jax.numpy as jnp
from jax.experimental import pallas as pl
from jax.experimental.pallas import tpu as pltpu

ACTIVATIONS = ['identity', 'tanh', 'relu', 'lrelu', 'prelu', 'celu',
               'selu', 'softplus', 'sigmoid', 'sine']

# PyTorch defaults
_LRELU_SLOPE = 0.01
_PRELU_INIT = 0.25            # nn.PReLU() default: single shared weight = 0.25
_CELU_ALPHA = 1.0
_SELU_ALPHA = 1.6732632423543772
_SELU_SCALE = 1.0507009873554805
_SOFTPLUS_THRESHOLD = 20.0    # nn.Softplus(beta=1, threshold=20)

_LANES = 128
_MIN_TILE_ROWS = 8                       # sublane granularity
_TARGET_TILE_BYTES = 2 * 1024 * 1024     # ~2 MiB / buffer; 4 buffers = 8 MiB
_VMEM_LIMIT_BYTES = 32 * 1024 * 1024     # safe on v5e (128 MiB) .. v7x (64 MiB)

_TRANSCENDENTAL = frozenset({'tanh', 'celu', 'selu', 'softplus', 'sigmoid', 'sine'})
_FLOPS_PER_ELEM = {'tanh': 1, 'relu': 1, 'lrelu': 2, 'prelu': 2, 'celu': 4,
                   'selu': 5, 'softplus': 3, 'sigmoid': 3, 'sine': 1}


@functools.lru_cache(maxsize=1)
def _bf16_compute_ok():
    """bf16 VPU/EUP exists on v6e and later; v5e and older need f32 math."""
    try:
        kind = jax.devices()[0].device_kind.lower()
    except Exception:
        return False
    return not any(tag in kind for tag in ('v2', 'v3', 'v4', 'v5'))


def _apply(name, x):
    """Elementwise activation on an in-register tile (dtype = compute dtype)."""
    if name == 'tanh':
        return jnp.tanh(x)
    if name == 'relu':
        return jnp.maximum(x, 0.0)
    if name == 'lrelu':
        return jnp.where(x >= 0.0, x, _LRELU_SLOPE * x)
    if name == 'celu':
        # max(0,x) + min(0, alpha*expm1(x/alpha)); expm1 avoids cancellation near 0
        neg = _CELU_ALPHA * jnp.expm1(jnp.minimum(x, 0.0) / _CELU_ALPHA)
        return jnp.maximum(x, 0.0) + jnp.minimum(neg, 0.0)
    if name == 'selu':
        neg = _SELU_ALPHA * jnp.expm1(jnp.minimum(x, 0.0))
        return _SELU_SCALE * (jnp.maximum(x, 0.0) + neg)
    if name == 'softplus':
        # torch.nn.Softplus(beta=1, threshold=20): linear above threshold
        sp = jnp.log1p(jnp.exp(jnp.minimum(x, _SOFTPLUS_THRESHOLD)))
        return jnp.where(x > _SOFTPLUS_THRESHOLD, x, sp)
    if name == 'sigmoid':
        # tanh form: one EUP op, no VPU divide
        return 0.5 * (jnp.tanh(0.5 * x) + 1.0)
    if name == 'sine':
        return jnp.sin(x)
    raise ValueError('Activation not recognized')


def _act_kernel(name, compute_dtype, x_ref, o_ref):
    """x_ref / o_ref: (tile_rows, 128) VMEM tiles, native-dtype I/O."""
    x = x_ref[...].astype(compute_dtype)
    o_ref[...] = _apply(name, x).astype(o_ref.dtype)


def _prelu_kernel(w_ref, x_ref, o_ref):
    """w_ref: (1,) f32 in SMEM (shared PReLU weight). f32 compute (VPU-only op)."""
    x = x_ref[...].astype(jnp.float32)
    a = w_ref[0]
    o_ref[...] = jnp.where(x >= 0.0, x, a * x).astype(o_ref.dtype)


def _choose_tiling(rows, itemsize):
    """Returns (tile_rows, num_blocks)."""
    max_tile_rows = max(
        _MIN_TILE_ROWS,
        (_TARGET_TILE_BYTES // (_LANES * itemsize)) // _MIN_TILE_ROWS * _MIN_TILE_ROWS)
    if rows < 2 * _MIN_TILE_ROWS:
        # Tiny: single full-extent block (block == array dims, (8,128) rule N/A).
        return rows, 1
    if rows <= max_tile_rows:
        # Medium: exactly 2 blocks -> both v7x TCs busy + DMA/compute overlap.
        tile_rows = pl.cdiv(pl.cdiv(rows, 2), _MIN_TILE_ROWS) * _MIN_TILE_ROWS
    else:
        tile_rows = max_tile_rows
    return tile_rows, pl.cdiv(rows, tile_rows)


def meta_activation(x, name, prelu_weight=None):
    """Applies MetaActivation(name) to x (any shape / float dtype), via Pallas."""
    assert name in ACTIVATIONS

    # Identity is a no-op: do not launch a memory-bound kernel for it.
    if name == 'identity':
        return x

    orig_shape = x.shape
    dtype = x.dtype
    total = int(math.prod(orig_shape)) if orig_shape else 1
    if total == 0:
        return x

    itemsize = jnp.dtype(dtype).itemsize
    rows = pl.cdiv(total, _LANES)
    tail = rows * _LANES - total

    flat = x.reshape(-1)
    if tail:
        # Only the sub-128 tail is padded; ragged last *block* is masked by Pallas.
        flat = jnp.pad(flat, (0, tail))
    x2d = flat.reshape(rows, _LANES)          # lane-dense slab, native dtype

    tile_rows, grid_n = _choose_tiling(rows, itemsize)

    # bf16-native compute on v6e/v7x keeps EUP/VPU off the critical slot at
    # high HBM bandwidth; f32 everywhere else.
    compute_dtype = dtype if (dtype == jnp.bfloat16 and _bf16_compute_ok()) else jnp.float32

    cost = pl.CostEstimate(
        flops=_FLOPS_PER_ELEM.get(name, 2) * total,
        transcendentals=total if name in _TRANSCENDENTAL else 0,
        bytes_accessed=2 * total * itemsize)

    tile_spec = pl.BlockSpec((tile_rows, _LANES), lambda i: (i, 0))
    common = dict(
        out_shape=jax.ShapeDtypeStruct((rows, _LANES), dtype),
        grid=(grid_n,),
        out_specs=pl.BlockSpec((tile_rows, _LANES), lambda i: (i, 0)),
        compiler_params=pltpu.CompilerParams(
            dimension_semantics=("parallel",),
            vmem_limit_bytes=_VMEM_LIMIT_BYTES),
        cost_estimate=cost,
    )

    if name == 'prelu':
        # Only the shared-weight (num_parameters=1, PyTorch default) form:
        # the flattened layout discards channel structure.
        if prelu_weight is None:
            prelu_weight = jnp.full((1,), _PRELU_INIT, dtype=jnp.float32)
        else:
            prelu_weight = jnp.asarray(prelu_weight, dtype=jnp.float32).reshape(-1)
            assert prelu_weight.shape == (1,), (
                "meta_activation('prelu') supports only a single shared weight")
        out2d = pl.pallas_call(
            _prelu_kernel,
            in_specs=[pl.BlockSpec(memory_space=pltpu.MemorySpace.SMEM), tile_spec],
            **common,
        )(prelu_weight, x2d)
    else:
        out2d = pl.pallas_call(
            functools.partial(_act_kernel, name, compute_dtype),
            in_specs=[tile_spec],
            **common,
        )(x2d)

    out_flat = out2d.reshape(-1)
    if tail:
        out_flat = out_flat[:total]
    return out_flat.reshape(orig_shape)


if __name__ == "__main__":
    key = jax.random.PRNGKey(0)
    # NCHW input, small shapes: batch=2, channels=4, spatial=16x16
    x = jax.random.normal(key, (2, 4, 16, 16), dtype=jnp.float32) * 3.0

    outs = {}
    for name in ACTIVATIONS:
        y = meta_activation(x, name)
        y = jax.block_until_ready(y)
        assert y.shape == x.shape and y.dtype == x.dtype
        outs[name] = y

    # light sanity checks vs jnp references (no torch dependency)
    assert bool(jnp.all(outs['identity'] == x))
    assert bool(jnp.all(outs['relu'] >= 0.0))
    assert bool(jnp.allclose(outs['tanh'], jnp.tanh(x), atol=1e-5))
    assert bool(jnp.allclose(outs['sigmoid'], jax.nn.sigmoid(x), atol=1e-5))
    assert bool(jnp.allclose(outs['sine'], jnp.sin(x), atol=1e-5))
    assert bool(jnp.allclose(outs['softplus'], jax.nn.softplus(x), atol=1e-5))
    assert bool(jnp.allclose(outs['selu'], jax.nn.selu(x), atol=1e-5))
    assert bool(jnp.allclose(outs['celu'], jax.nn.celu(x), atol=1e-5))
    assert bool(jnp.allclose(outs['lrelu'],
                             jnp.where(x >= 0, x, 0.01 * x), atol=1e-6))
    assert bool(jnp.allclose(outs['prelu'],
                             jnp.where(x >= 0, x, 0.25 * x), atol=1e-6))

    # exercise the tail-padding path (size not a multiple of 128)
    x_odd = jax.random.normal(jax.random.PRNGKey(1), (2, 3, 7, 5),
                              dtype=jnp.float32)
    y_odd = jax.block_until_ready(meta_activation(x_odd, 'tanh'))
    assert y_odd.shape == x_odd.shape
    assert bool(jnp.allclose(y_odd, jnp.tanh(x_odd), atol=1e-5))

    # exercise the ragged (masked) last block path: rows not a multiple of tile_rows
    x_big = jax.random.normal(jax.random.PRNGKey(2), (3, 5, 33, 128),
                              dtype=jnp.float32)
    y_big = jax.block_until_ready(meta_activation(x_big, 'selu'))
    assert bool(jnp.allclose(y_big, jax.nn.selu(x_big), atol=1e-5))

    # bf16 I/O (bf16-native compute on v6e/v7x, f32 fallback on v5e)
    x_bf16 = x.astype(jnp.bfloat16)
    y_bf16 = jax.block_until_ready(meta_activation(x_bf16, 'relu'))
    assert y_bf16.dtype == jnp.bfloat16 and y_bf16.shape == x.shape
    assert bool(jnp.all(y_bf16 >= 0))

    print("KERNEL_OK")
</pallas_src>

<mosaic_0001>
module attributes {stable_mosaic.version = 11 : i64} {
  func.func @_act_kernel(%arg0: i32, %arg1: memref<8x128xf32, #tpu.memory_space<vmem>>, %arg2: memref<8x128xf32, #tpu.memory_space<vmem>>) attributes {dimension_semantics = [#tpu.dimension_semantics<parallel>], iteration_bounds = array<i64: 2>, scalar_prefetch = 0 : i64, scratch_operands = 0 : i64, tpu.core_type = #tpu.core_type<tc>, window_params = [{transform_indices = @transform_0, window_bounds = array<i64: 8, 128>}, {transform_indices = @transform_1, window_bounds = array<i64: 8, 128>}]} {
    %c0 = arith.constant 0 : index
    %c0_0 = arith.constant 0 : index
    %0 = vector.load %arg1[%c0, %c0_0] : memref<8x128xf32, #tpu.memory_space<vmem>>, vector<8x128xf32>
    %1 = math.tanh %0 : vector<8x128xf32>
    %c0_1 = arith.constant 0 : index
    %c0_2 = arith.constant 0 : index
    %2 = vector.load %arg2[%c0_1, %c0_2] : memref<8x128xf32, #tpu.memory_space<vmem>>, vector<8x128xf32>
    tpu.vector_store %arg2[%c0_1, %c0_2], %1 {strides = array<i32>} : memref<8x128xf32, #tpu.memory_space<vmem>>, vector<8x128xf32>,
    return
  }
  func.func @transform_0(%arg0: i32) -> (i32, i32) {
    %c0_i32 = arith.constant 0 : i32
    %c0_i32_0 = arith.constant 0 : i32
    return %arg0, %c0_i32 : i32, i32
  }
  func.func @transform_1(%arg0: i32) -> (i32, i32) {
    %c0_i32 = arith.constant 0 : i32
    %c0_i32_0 = arith.constant 0 : i32
    return %arg0, %c0_i32 : i32, i32
  }
}

</mosaic_0001>

<bundles_post_ra>
// kernel: tpu_custom_call.1
= control target key start
LH: loop header
LB: loop body
LE: loop exit
PB: predicated region body
PF: predicated region fallthrough
CT: control target
= control target key end

     0   :  { %6 = vsyncpa [#allocation3], 0  ;;  %s550_s0 = inlined_call_operand.hbm [shape: f32[16,128], index: 0, kind: input, shape index: {}]   ;;  %s551_s1 = inlined_call_operand.hbm [shape: f32[16,128], index: 1, kind: output, shape index: {}]  }
   0x1   :  { %8 = vsyncpa [#allocation3 + $0x1], 0 }
   0x2   :  { %9 = vsyncpa [#allocation4], 0 }
   0x3   :  { %11 = vsyncpa [#allocation4 + $0x1], 0  ;;  %s389_s6 = smov 0   ;;  %s391_s7 = smov 0  }
   0x4   :  { %s393_s8 = smov 0   ;;  %s395_s9 = smov 0  }
   0x5 LB: > { %s410_s10 = sadd.s32 4294967295, %s375_s9   ;;  %s219_s11 = sadd.s32 4294967294, %s375_s9   ;;  %s375_s9 = sphi %s395_s9, %s566_s9   ;;  %s371_s8 = sphi %s393_s8, %s565_s8   ;;  %s367_s7 = sphi %s391_s7, %s564_s7   ;;  %s363_s6 = sphi %s389_s6, %s563_s6  }
   0x6   : > { %s414_s12 = sadd.s32 1, %s375_s9   ;;  %s24_s13 = sadd.s32 1, %s371_s8 }
   0x7   : > { %s21_s14 = ssub.s32 %s375_s9, %s414_s12  ;;  %p31_p0 = scmp.ne.s32.totalorder %s371_s8, %s367_s7 }
   0x8   : > { %p22_p1 = scmp.eq.s32.totalorder %s21_s14, 0  ;;  %p32_p2 = scmp.eq.s32.totalorder %s375_s9, 0 }
   0x9   : > { %p37_p3 = scmp.ne.s32.totalorder %s367_s7, %s363_s6  ;;  %p38_p4 = scmp.eq.s32.totalorder %s410_s10, 0 }
   0xa   : > { %s426_s15 = scalar_select %p22_p1, %s371_s8, %s24_s13  }
   0xb   : > { %p428_p5 = por %p32_p2, %p31_p0  ;;  %p432_p6 = por %p38_p4, %p37_p3 }
   0xc   : > { %p61_p7 = scmp.eq.s32.totalorder %s410_s10, 1  ;;  %p67_p8 = scmp.eq.s32.totalorder %s219_s11, 1 }
   0xd   : > { %p243_p10 = scmp.lt.s32.totalorder %s375_s9, 2  ;;  %s87_s20 = sand.u32 1, %s371_s8  }
   0xe   : > { %p439_p11 = por %p61_p7, %p31_p0  ;;  %p443_p12 = por %p67_p8, %p37_p3 }
   0xf   : > { %s223_s21 = sshll.u32 %s375_s9, 7  ;;  %s222_s22 = sshll.u32 %s87_s20, 3 }
  0x10   : > { %s555_s18 = scalar_select %p439_p11, 1, 0 }
  0x11   : > { %s556_s19 = scalar_select %p443_p12, 1, 0 }
  0x12   : > { %s452_s25 = scalar_lea.hbm %s550_s0, %s223_s21  ;;  %s91_s26 = scalar_lea.vmem [#allocation2], %s222_s22 }
  0x13   : > { %s98_s27 = sshll.u32 %s91_s26, 4  ;;  %p456_p13 = pnand %p243_p10, %p428_p5  ;;  %s460_s27 = int_to_ptr.vmem [resolvable:$true] %s98_s27 }
  0x14   : > { %s88_s29 = scalar_lea.sflag [#allocation3], %s87_s20  ;;  %s279_s30 = scalar_lea.hbm %s452_s25, 128 }
  0x15   : > { %p280_p2 = scmp.ne.s32.totalorder %s452_s25, %s279_s30  ;;  %p281_p3 = pneg %p456_p13 }
  0x16   : > { %s284_s4 = scalar_lea.hbm %s550_s0, 256  ;;  %p285_p5 = scmp.lt.u32.totalorder %s452_s25, %s550_s0 }
  0x17   : > { %p282_p4 = pnand %p281_p3, %p280_p2  ;;  %p286_p8 = scmp.lt.u32.totalorder %s284_s4, %s279_s30 }
  0x18   : > { %p288_p9 = scmp.lt.u32.totalorder %s279_s30, %s452_s25 }
  0x19   : > { %p283_p7 = pneg %p282_p4  ;;  %p287_p10 = por %p286_p8, %p285_p5 }
  0x1b   : > { %p289_p0 = por %p288_p9, %p287_p10 }
  0x1d   : > { %p290_p1 = pnand %p289_p0, %p283_p7 }
  0x1f   : > { %293 = shalt.err (!%p290_p1)
}
  0x20   : > { %s294_s13 = scalar_lea.vmem %s460_s27, 128  ;;  %s377_s14 = smov [#allocation2]  }
  0x21   : > { %p295_p2 = scmp.ne.s32.totalorder %s460_s27, %s294_s13  ;;  %s299_s16 = sshll.u32 %s377_s14, 4  ;;  %s300_s16 = int_to_ptr.vmem [resolvable:$false] %s299_s16 }
  0x22   : > { %s301_s20 = scalar_lea.vmem %s300_s16, 256  ;;  %p302_p11 = scmp.lt.s32.totalorder %s460_s27, %s300_s16 }
  0x23   : > { %p297_p4 = pnand %p295_p2, %p281_p3  ;;  %p303_p5 = scmp.lt.s32.totalorder %s301_s20, %s294_s13 }
  0x25   : > { %p298_p12 = pneg %p297_p4  ;;  %p304_p8 = por %p303_p5, %p302_p11 }
  0x27   : > { %p305_p9 = pnand %p304_p8, %p298_p12 }
  0x29   : > { %308 = shalt.err (!%p305_p9)
}
  0x2a   : > { %238 = dma.hbm_to_vmem [thread:$0]  (!%p456_p13), %s452_s25, 128, %s460_s27, %s88_s29  }
  0x2b   : > { %p558_p0 = scmp.lt.s32.totalorder %s375_s9, 3  ;;  %p559_p1 = scmp.ge.s32.totalorder %s375_s9, 1 }
  0x2d   : > { %p104_p3 = pnand %p559_p1, %p558_p0 }
  0x2e   : > { %s494_s21 = sand.u32 (!%p104_p3), 1, %s367_s7  }
  0x2f   : > { %107 = sbr.rel (%p104_p3) target bundleno = 81 (0x51), region = 24  ;;  %s225_s22 = sshll.u32 (!%p104_p3), %s494_s21, 3 }
  0x30   : > { %s110_s23 = scalar_lea.sflag (!%p104_p3), [#allocation3], %s494_s21  ;;  %s113_s24 = scalar_lea.vmem (!%p104_p3), [#allocation2], %s225_s22 }
  0x36   : > { %354 = dma.done.wait (%p432_p6), %s110_s23, 128  }
  0x37   : > { %356 = vsyncadd (%p432_p6), %s110_s23, 4294967168  ;;  %v132_v0 = vld [vmem:[%s113_s24] sm:$0xff]  ;;  %s131_s25 = scalar_lea.vmem [#allocation5], %s225_s22  ;;  %s228_s27 = sshll.u32 %s410_s10, 7 }
  0x38   : > { %277 = vtanh.f32 %v132_v0  ;;  %s149_s26 = sshll.u32 %s131_s25, 4  ;;  %s508_s30 = scalar_lea.hbm %s551_s1, %s228_s27  ;;  %s503_s26 = int_to_ptr.vmem [resolvable:$true] %s149_s26 }
  0x39   : > { %s136_s17 = scalar_lea.sflag [#allocation4], %s494_s21  ;;  %s309_s2 = scalar_lea.vmem %s503_s26, 128 }
  0x3a   : > { %p310_p6 = scmp.ne.s32.totalorder %s503_s26, %s309_s2  ;;  %p560_p11 = scmp.ne.s32.totalorder %s555_s18, 0 }
  0x3b   : > { %s378_s3 = smov [#allocation5]  }
  0x3c   : > { %p311_p12 = pnand %p310_p6, %p560_p11  ;;  %s313_s10 = sshll.u32 %s378_s3, 4  ;;  %s314_s10 = int_to_ptr.vmem [resolvable:$false] %s313_s10 }
  0x3d   : > { %s315_s4 = scalar_lea.vmem %s314_s10, 256  ;;  %p316_p7 = scmp.lt.s32.totalorder %s503_s26, %s314_s10 }
  0x3e   : > { %p312_p13 = pneg %p311_p12  ;;  %p317_p10 = scmp.lt.s32.totalorder %s315_s4, %s309_s2 }
  0x40   : > { %p318_p2 = por %p317_p10, %p316_p7 }
  0x42   : > { %v278_v1 = vpop.eup %277  ;;  %p319_p4 = pnand %p318_p2, %p312_p13 }
  0x43   : > { %134 = vst [vmem:[%s131_s25] sm:$0xff] %v278_v1 }
  0x44   : > { %322 = shalt.err (!%p319_p4)
}
  0x45   : > { %s323_s5 = scalar_lea.hbm %s508_s30, 128  ;;  %s327_s14 = scalar_lea.hbm %s551_s1, 256 }
  0x46   : > { %p324_p5 = scmp.ne.s32.totalorder %s508_s30, %s323_s5  ;;  %p328_p0 = scmp.lt.u32.totalorder %s508_s30, %s551_s1 }
  0x47   : > { %p329_p1 = scmp.lt.u32.totalorder %s327_s14, %s323_s5  ;;  %p331_p6 = scmp.lt.u32.totalorder %s323_s5, %s508_s30 }
  0x48   : > { %p325_p8 = pnand %p324_p5, %p560_p11 }
  0x49   : > { %p330_p3 = por %p329_p1, %p328_p0 }
  0x4a   : > { %p326_p9 = pneg %p325_p8 }
  0x4b   : > { %p332_p12 = por %p331_p6, %p330_p3 }
  0x4d   : > { %p333_p13 = pnand %p332_p12, %p326_p9 }
  0x4f   : > { %336 = shalt.err (!%p333_p13)
}
  0x50   : > { %233 = dma.vmem_to_hbm [thread:$0]  (%p560_p11), %s503_s26, 128, %s508_s30, %s136_s17  }
  0x51 PF: > { %s161_s21 = sand.u32 1, %s363_s6   ;;  %p561_p7 = scmp.ne.s32.totalorder %s556_s19, 0 }
  0x52   : > { %p562_p10 = scmp.ge.s32.totalorder %s375_s9, 2  ;;  %s162_s22 = scalar_lea.sflag [#allocation4], %s161_s21 }
  0x54   : > { %p240_p2 = pnand %p562_p10, %p561_p7 }
  0x56   : > { %358 = dma.done.wait (!%p240_p2), %s162_s22, 128  }
  0x57   : > { %360 = vsyncadd (!%p240_p2), %s162_s22, 4294967168  ;;  %p14_p4 = scmp.ge.s32.totalorder %s414_s12, 4   ;;  %s563_s6 = smov %s367_s7 }
  0x58   : > { %s564_s7 = smov %s371_s8  ;;  %s565_s8 = smov %s426_s15 }
  0x59   : > { %s566_s9 = smov %s414_s12  ;;  %16 = sbr.rel (!%p14_p4) target bundleno = 5 (0x5), region = 69 }
  0x60   :  { %167 = vsyncpa [#allocation3], 1 }
  0x61   :  { %169 = vsyncpa [#allocation3 + $0x1], 1 }
  0x62   :  { %170 = vsyncpa [#allocation4], 1 }
  0x63   :  { %172 = vsyncpa [#allocation4 + $0x1], 1 }

</bundles_post_ra>
